<compile_context>
chip_gen: v7x
topology: tpu7x:2x2x1
jax: 0.10.0
libtpu: 0.0.40
codegen_flags: <defaults>
</compile_context>

<pallas_src>
import math

import jax
import jax.numpy as jnp
from jax.experimental import pallas as pl
from jax.experimental.pallas import tpu as pltpu


# ------------------------------ Pallas kernel -------------------------------

def _gru_gate_kernel(x_ref, y_ref, wrzx_ref, wrzy_ref, brz_ref,
                     wgx_ref, wgy_ref, o_ref):
    # x, y   : (TM, F)   f32
    # wrzx   : (F, 2F)   x-half of [Wr^T | Wz^T]   (matmul dtype: f32 or bf16)
    # wrzy   : (F, 2F)   y-half of [Wr^T | Wz^T]
    # brz    : (1, 2F)   [0 | bz]                  (f32)
    # wgx    : (F, F)    x-half of Wg^T
    # wgy    : (F, F)    y-half of Wg^T
    x = x_ref[...]
    y = y_ref[...]
    f = x.shape[-1]
    mm = wrzx_ref.dtype
    xm = x.astype(mm)
    ym = y.astype(mm)

    # fused r/z pre-activation: [x;y] @ [Wr^T|Wz^T] done as two K=F dots
    rz = jax.nn.sigmoid(
        jnp.dot(xm, wrzx_ref[...], preferred_element_type=jnp.float32)
        + jnp.dot(ym, wrzy_ref[...], preferred_element_type=jnp.float32)
        + brz_ref[...])
    r = rz[:, :f]
    z = rz[:, f:]

    # candidate: [r*x ; y] @ Wg^T as two K=F dots (no concat)
    h = jnp.tanh(
        jnp.dot((r * x).astype(mm), wgx_ref[...],
                preferred_element_type=jnp.float32)
        + jnp.dot(ym, wgy_ref[...], preferred_element_type=jnp.float32))

    # (1 - z) * x + z * h  ==  x + z * (h - x)
    o_ref[...] = x + z * (h - x)


# ------------------------------ wrapper --------------------------------------

def gru_gating(x, y, wr, wz, bz, wg, *, block_m=1024, use_bf16_matmul=False):
    """GRU_gating forward.  x, y: (..., F).  wr/wz/wg: PyTorch layout (F, 2F)."""
    assert x.shape == y.shape
    f = x.shape[-1]
    assert wr.shape == (f, 2 * f) and wz.shape == (f, 2 * f) and wg.shape == (f, 2 * f)
    lead = x.shape[:-1]
    m = math.prod(lead) if lead else 1

    x2 = x.reshape(m, f).astype(jnp.float32)
    y2 = y.reshape(m, f).astype(jnp.float32)

    # bf16 matmul operands (f32 accumulate) pay off on v6e/v7x; f32 by default
    # to match the PyTorch reference bit-for-bit-ish.
    mm_dtype = jnp.bfloat16 if use_bf16_matmul else jnp.float32

    # PyTorch Linear stores weight as (out, in); matmul wants (in, out).
    # xy @ W^T == x @ W[:, :F]^T + y @ W[:, F:]^T  -> split once, host side.
    wrz_x = jnp.concatenate([wr[:, :f].T, wz[:, :f].T], axis=1).astype(mm_dtype)  # (F, 2F)
    wrz_y = jnp.concatenate([wr[:, f:].T, wz[:, f:].T], axis=1).astype(mm_dtype)  # (F, 2F)
    brz = jnp.concatenate(
        [jnp.zeros((f,), jnp.float32), bz.astype(jnp.float32)]).reshape(1, 2 * f)
    wg_x = wg[:, :f].T.astype(mm_dtype)                                           # (F, F)
    wg_y = wg[:, f:].T.astype(mm_dtype)                                           # (F, F)

    # Row tiling: whole thing in one block when small, else block_m-row tiles
    # (sublane aligned).  Weight blocks use a constant index map -> fetched once,
    # VMEM resident across grid steps.
    tm = m if m <= block_m else block_m
    grid = (pl.cdiv(m, tm),)

    out = pl.pallas_call(
        _gru_gate_kernel,
        grid=grid,
        in_specs=[
            pl.BlockSpec((tm, f), lambda i: (i, 0)),         # x
            pl.BlockSpec((tm, f), lambda i: (i, 0)),         # y
            pl.BlockSpec((f, 2 * f), lambda i: (0, 0)),      # [Wr^T|Wz^T] x-half
            pl.BlockSpec((f, 2 * f), lambda i: (0, 0)),      # [Wr^T|Wz^T] y-half
            pl.BlockSpec((1, 2 * f), lambda i: (0, 0)),      # [0 | bz]
            pl.BlockSpec((f, f), lambda i: (0, 0)),          # Wg^T x-half
            pl.BlockSpec((f, f), lambda i: (0, 0)),          # Wg^T y-half
        ],
        out_specs=pl.BlockSpec((tm, f), lambda i: (i, 0)),
        out_shape=jax.ShapeDtypeStruct((m, f), jnp.float32),
        compiler_params=pltpu.CompilerParams(
            dimension_semantics=("parallel",)),
    )(x2, y2, wrz_x, wrz_y, brz, wg_x, wg_y)

    return out.reshape(*lead, f)


# -------------------------------- main ---------------------------------------

if __name__ == "__main__":
    # shapes consistent with how GRU_gating is used in the relational module:
    # (seq = H*W, batch, n_features)
    S, B, F_ = 64, 2, 32

    key = jax.random.PRNGKey(0)
    kx, ky, kr, kz, kb, kg = jax.random.split(key, 6)
    bound = 1.0 / math.sqrt(2 * F_)   # PyTorch Linear default init bound

    x = jax.random.normal(kx, (S, B, F_), jnp.float32)
    y = jax.random.normal(ky, (S, B, F_), jnp.float32)
    wr = jax.random.uniform(kr, (F_, 2 * F_), jnp.float32, -bound, bound)
    wz = jax.random.uniform(kz, (F_, 2 * F_), jnp.float32, -bound, bound)
    bz = jax.random.uniform(kb, (F_,), jnp.float32, -bound, bound)
    wg = jax.random.uniform(kg, (F_, 2 * F_), jnp.float32, -bound, bound)

    out = gru_gating(x, y, wr, wz, bz, wg)
    out = jax.block_until_ready(out)

    # pure-JAX reference (mirrors the PyTorch forward exactly)
    xy = jnp.concatenate([x, y], axis=-1)
    r_ref = jax.nn.sigmoid(xy @ wr.T)
    z_ref = jax.nn.sigmoid(xy @ wz.T + bz)
    h_ref = jnp.tanh(jnp.concatenate([r_ref * x, y], axis=-1) @ wg.T)
    ref = (1.0 - z_ref) * x + z_ref * h_ref

    assert out.shape == (S, B, F_), out.shape
    assert bool(jnp.all(jnp.isfinite(out)))
    assert jnp.allclose(out, ref, atol=1e-5, rtol=1e-5), \
        float(jnp.max(jnp.abs(out - ref)))
    print("KERNEL_OK")
</pallas_src>

<mosaic_0001>
module attributes {stable_mosaic.version = 11 : i64} {
  func.func @_gru_gate_kernel(%arg0: i32, %arg1: memref<128x32xf32, #tpu.memory_space<vmem>>, %arg2: memref<128x32xf32, #tpu.memory_space<vmem>>, %arg3: memref<32x64xf32, #tpu.memory_space<vmem>>, %arg4: memref<32x64xf32, #tpu.memory_space<vmem>>, %arg5: memref<1x64xf32, #tpu.memory_space<vmem>>, %arg6: memref<32x32xf32, #tpu.memory_space<vmem>>, %arg7: memref<32x32xf32, #tpu.memory_space<vmem>>, %arg8: memref<128x32xf32, #tpu.memory_space<vmem>>) attributes {dimension_semantics = [#tpu.dimension_semantics<parallel>], iteration_bounds = array<i64: 1>, scalar_prefetch = 0 : i64, scratch_operands = 0 : i64, tpu.core_type = #tpu.core_type<tc>, window_params = [{transform_indices = @transform_0, window_bounds = array<i64: 128, 32>}, {transform_indices = @transform_1, window_bounds = array<i64: 128, 32>}, {pipeline_mode = #tpu.pipeline_mode<synchronous>, transform_indices = @transform_2, window_bounds = array<i64: 32, 64>}, {pipeline_mode = #tpu.pipeline_mode<synchronous>, transform_indices = @transform_3, window_bounds = array<i64: 32, 64>}, {pipeline_mode = #tpu.pipeline_mode<synchronous>, transform_indices = @transform_4, window_bounds = array<i64: 1, 64>}, {pipeline_mode = #tpu.pipeline_mode<synchronous>, transform_indices = @transform_5, window_bounds = array<i64: 32, 32>}, {pipeline_mode = #tpu.pipeline_mode<synchronous>, transform_indices = @transform_6, window_bounds = array<i64: 32, 32>}, {transform_indices = @transform_7, window_bounds = array<i64: 128, 32>}]} {
    %c0 = arith.constant 0 : index
    %c0_0 = arith.constant 0 : index
    %0 = vector.load %arg1[%c0, %c0_0] : memref<128x32xf32, #tpu.memory_space<vmem>>, vector<128x32xf32>
    %c0_1 = arith.constant 0 : index
    %c0_2 = arith.constant 0 : index
    %1 = vector.load %arg2[%c0_1, %c0_2] : memref<128x32xf32, #tpu.memory_space<vmem>>, vector<128x32xf32>
    %c0_3 = arith.constant 0 : index
    %c0_4 = arith.constant 0 : index
    %2 = vector.load %arg3[%c0_3, %c0_4] : memref<32x64xf32, #tpu.memory_space<vmem>>, vector<32x64xf32>
    %cst = arith.constant dense<0.000000e+00> : vector<128x64xf32>
    %3 = tpu.matmul %0, %2, %cst {dimension_numbers = #tpu.dot_dimension_numbers<[1], [0], [0], [1], [0, 0, 1, 1], [], []>} : vector<128x32xf32>, vector<32x64xf32>, vector<128x64xf32> -> vector<128x64xf32>
    %c0_5 = arith.constant 0 : index
    %c0_6 = arith.constant 0 : index
    %4 = vector.load %arg4[%c0_5, %c0_6] : memref<32x64xf32, #tpu.memory_space<vmem>>, vector<32x64xf32>
    %cst_7 = arith.constant dense<0.000000e+00> : vector<128x64xf32>
    %5 = tpu.matmul %1, %4, %cst_7 {dimension_numbers = #tpu.dot_dimension_numbers<[1], [0], [0], [1], [0, 0, 1, 1], [], []>} : vector<128x32xf32>, vector<32x64xf32>, vector<128x64xf32> -> vector<128x64xf32>
    %6 = arith.addf %3, %5 : vector<128x64xf32>
    %c0_8 = arith.constant 0 : index
    %c0_9 = arith.constant 0 : index
    %7 = vector.load %arg5[%c0_8, %c0_9] : memref<1x64xf32, #tpu.memory_space<vmem>>, vector<1x64xf32>
    %8 = vector.broadcast %7 : vector<1x64xf32> to vector<128x64xf32>
    %9 = arith.addf %6, %8 : vector<128x64xf32>
    %10 = arith.negf %9 : vector<128x64xf32>
    %11 = math.exp %10 : vector<128x64xf32>
    %cst_10 = arith.constant 1.000000e+00 : f32
    %12 = vector.broadcast %cst_10 : f32 to vector<128x64xf32>
    %13 = arith.addf %12, %11 : vector<128x64xf32>
    %14 = arith.divf %12, %13 : vector<128x64xf32>
    %15 = vector.extract_strided_slice %14 {offsets = [0, 0], sizes = [128, 32], strides = [1, 1]} : vector<128x64xf32> to vector<128x32xf32>
    %16 = vector.extract_strided_slice %14 {offsets = [0, 32], sizes = [128, 32], strides = [1, 1]} : vector<128x64xf32> to vector<128x32xf32>
    %17 = arith.mulf %15, %0 : vector<128x32xf32>
    %c0_11 = arith.constant 0 : index
    %c0_12 = arith.constant 0 : index
    %18 = vector.load %arg6[%c0_11, %c0_12] : memref<32x32xf32, #tpu.memory_space<vmem>>, vector<32x32xf32>
    %cst_13 = arith.constant dense<0.000000e+00> : vector<128x32xf32>
    %19 = tpu.matmul %17, %18, %cst_13 {dimension_numbers = #tpu.dot_dimension_numbers<[1], [0], [0], [1], [0, 0, 1, 1], [], []>} : vector<128x32xf32>, vector<32x32xf32>, vector<128x32xf32> -> vector<128x32xf32>
    %c0_14 = arith.constant 0 : index
    %c0_15 = arith.constant 0 : index
    %20 = vector.load %arg7[%c0_14, %c0_15] : memref<32x32xf32, #tpu.memory_space<vmem>>, vector<32x32xf32>
    %cst_16 = arith.constant dense<0.000000e+00> : vector<128x32xf32>
    %21 = tpu.matmul %1, %20, %cst_16 {dimension_numbers = #tpu.dot_dimension_numbers<[1], [0], [0], [1], [0, 0, 1, 1], [], []>} : vector<128x32xf32>, vector<32x32xf32>, vector<128x32xf32> -> vector<128x32xf32>
    %22 = arith.addf %19, %21 : vector<128x32xf32>
    %23 = math.tanh %22 : vector<128x32xf32>
    %24 = arith.subf %23, %0 : vector<128x32xf32>
    %25 = arith.mulf %16, %24 : vector<128x32xf32>
    %26 = arith.addf %0, %25 : vector<128x32xf32>
    %c0_17 = arith.constant 0 : index
    %c0_18 = arith.constant 0 : index
    %27 = vector.load %arg8[%c0_17, %c0_18] : memref<128x32xf32, #tpu.memory_space<vmem>>, vector<128x32xf32>
    tpu.vector_store %arg8[%c0_17, %c0_18], %26 {strides = array<i32>} : memref<128x32xf32, #tpu.memory_space<vmem>>, vector<128x32xf32>,
    return
  }
  func.func @transform_0(%arg0: i32) -> (i32, i32) {
    %c0_i32 = arith.constant 0 : i32
    %c0_i32_0 = arith.constant 0 : i32
    return %arg0, %c0_i32 : i32, i32
  }
  func.func @transform_1(%arg0: i32) -> (i32, i32) {
    %c0_i32 = arith.constant 0 : i32
    %c0_i32_0 = arith.constant 0 : i32
    return %arg0, %c0_i32 : i32, i32
  }
  func.func @transform_2(%arg0: i32) -> (i32, i32) {
    %c0_i32 = arith.constant 0 : i32
    %c0_i32_0 = arith.constant 0 : i32
    %c0_i32_1 = arith.constant 0 : i32
    return %c0_i32, %c0_i32_0 : i32, i32
  }
  func.func @transform_3(%arg0: i32) -> (i32, i32) {
    %c0_i32 = arith.constant 0 : i32
    %c0_i32_0 = arith.constant 0 : i32
    %c0_i32_1 = arith.constant 0 : i32
    return %c0_i32, %c0_i32_0 : i32, i32
  }
  func.func @transform_4(%arg0: i32) -> (i32, i32) {
    %c0_i32 = arith.constant 0 : i32
    %c0_i32_0 = arith.constant 0 : i32
    %c0_i32_1 = arith.constant 0 : i32
    return %c0_i32, %c0_i32_0 : i32, i32
  }
  func.func @transform_5(%arg0: i32) -> (i32, i32) {
    %c0_i32 = arith.constant 0 : i32
    %c0_i32_0 = arith.constant 0 : i32
    %c0_i32_1 = arith.constant 0 : i32
    return %c0_i32, %c0_i32_0 : i32, i32
  }
  func.func @transform_6(%arg0: i32) -> (i32, i32) {
    %c0_i32 = arith.constant 0 : i32
    %c0_i32_0 = arith.constant 0 : i32
    %c0_i32_1 = arith.constant 0 : i32
    return %c0_i32, %c0_i32_0 : i32, i32
  }
  func.func @transform_7(%arg0: i32) -> (i32, i32) {
    %c0_i32 = arith.constant 0 : i32
    %c0_i32_0 = arith.constant 0 : i32
    return %arg0, %c0_i32 : i32, i32
  }
}

</mosaic_0001>

<bundles_post_ra>
// kernel: tpu_custom_call.1
= control target key start
LH: loop header
LB: loop body
LE: loop exit
PB: predicated region body
PF: predicated region fallthrough
CT: control target
= control target key end

     0   :  { %vm66_vm0 = vcmask 261120   ;;  %s2124_s3 = inlined_call_operand.vmem [shape: f32[32,64], index: 3, kind: input, shape index: {}]   ;;  %s2125_s1 = inlined_call_operand.vmem [shape: f32[128,32], index: 1, kind: input, shape index: {}]   ;;  %s2126_s2 = inlined_call_operand.vmem [shape: f32[32,64], index: 2, kind: input, shape index: {}]   ;;  %s2127_s6 = inlined_call_operand.vmem [shape: f32[32,32], index: 6, kind: input, shape index: {}]   ;;  %s2128_s0 = inlined_call_operand.vmem [shape: f32[128,32], index: 0, kind: input, shape index: {}]   ;;  %s2129_s5 = inlined_call_operand.vmem [shape: f32[32,32], index: 5, kind: input, shape index: {}]   ;;  %s2130_s4 = inlined_call_operand.vmem [shape: f32[1,64], index: 4, kind: input, shape index: {}]   ;;  %s2131_s7 = inlined_call_operand.vmem [shape: f32[128,32], index: 7, kind: output, shape index: {}]  }
   0x1   :  { %v62_v0 = vld [vmem:[%s2124_s3] sm:$0xff]  ;;  %v63_v1 = vld [vmem:[%s2124_s3 + $0x8] sm:$0xff]  ;;  %v64_v2 = vld [vmem:[%s2124_s3 + $0x10] sm:$0xff] }
   0x2   :  { %v1435_v3 = vpack.c.bf16 %v63_v1, %v62_v0  ;;  %v65_v4 = vld [vmem:[%s2124_s3 + $0x18] sm:$0xff]  ;;  %v42_v5 = vld [vmem:[%s2125_s1] sm:$0xff]  ;;  %v59_v8 = vld [vmem:[%s2126_s2 + $0x8] sm:$0xff] }
   0x3   :  { %v1439_v6 = vpack.c.bf16 %v65_v4, %v64_v2  ;;  %1315 = vmatprep.mubr.msk.f32.mxu0 %vm66_vm0, %v42_v5  ;;  %v58_v7 = vld [vmem:[%s2126_s2] sm:$0xff]  ;;  %1379 = vmatprep.mubr.msk.f32.mxu1 %vm66_vm0, %v42_v5  ;;  %v60_v10 = vld [vmem:[%s2126_s2 + $0x10] sm:$0xff]  ;;  %v61_v11 = vld [vmem:[%s2126_s2 + $0x18] sm:$0xff] }
   0x4   :  { %1436 = vmatprep.subr.bf16.mxu0 %v1435_v3  ;;  %v1443_v9 = vpack.c.bf16 %v59_v8, %v58_v7  ;;  %v43_v12 = vld [vmem:[%s2125_s1 + $0x8] sm:$0xff]  ;;  %v44_v13 = vld [vmem:[%s2125_s1 + $0x10] sm:$0xff]  ;;  %v1447_v14 = vpack.c.bf16 %v61_v11, %v60_v10  ;;  %v45_v15 = vld [vmem:[%s2125_s1 + $0x18] sm:$0xff] }
   0x5   :  { %1438 = vmatpush3.bf16.msra.mxu0 %v1435_v3  ;;  %v46_v16 = vld [vmem:[%s2125_s1 + $0x20] sm:$0xff]  ;;  %v593_v18 = vld [vmem:[%s2127_s6 + $0x8] sm:$0xff]  ;;  %v594_v20 = vld [vmem:[%s2127_s6 + $0x10] sm:$0xff] }
   0x6   :  { %1440 = vmatprep.subr.bf16.mxu0 %v1439_v6  ;;  %v592_v17 = vld [vmem:[%s2127_s6] sm:$0xff]  ;;  %v595_v21 = vld [vmem:[%s2127_s6 + $0x18] sm:$0xff]  ;;  %v47_v23 = vld [vmem:[%s2125_s1 + $0x28] sm:$0xff] }
   0x7   :  { %v1451_v19 = vpack.c.bf16 %v593_v18, %v592_v17  ;;  %v1455_v22 = vpack.c.bf16 %v595_v21, %v594_v20  ;;  %v48_v24 = vld [vmem:[%s2125_s1 + $0x30] sm:$0xff]  ;;  %v49_v25 = vld [vmem:[%s2125_s1 + $0x38] sm:$0xff]  ;;  %v50_v26 = vld [vmem:[%s2125_s1 + $0x40] sm:$0xff] }
   0x8   :  { %v51_v27 = vld [vmem:[%s2125_s1 + $0x48] sm:$0xff]  ;;  %v52_v28 = vld [vmem:[%s2125_s1 + $0x50] sm:$0xff]  ;;  %v53_v29 = vld [vmem:[%s2125_s1 + $0x58] sm:$0xff] }
   0x9   :  { %1442 = vmatpush3.bf16.msra.mxu0 %v1439_v6  ;;  %1452 = vmatprep.subr.bf16.mxu1 %v1451_v19  ;;  %v54_v30 = vld [vmem:[%s2125_s1 + $0x60] sm:$0xff]  ;;  %v55_v31 = vld [vmem:[%s2125_s1 + $0x68] sm:$0xff]  ;;  %v56_v32 = vld [vmem:[%s2125_s1 + $0x70] sm:$0xff] }
   0xa   :  { %1444 = vmatprep.subr.bf16.mxu0 %v1443_v9  ;;  %1454 = vmatpush3.bf16.msra.mxu1 %v1451_v19  ;;  %v57_v33 = vld [vmem:[%s2125_s1 + $0x78] sm:$0xff]  ;;  %v1748_v34 = vld [vmem:[%s2128_s0] sm:$0xff]  ;;  %v1758_v35 = vld [vmem:[%s2128_s0 + $0x8] sm:$0xff] }
   0xb   :  { %1456 = vmatprep.subr.bf16.mxu1 %v1455_v22  ;;  %v1763_v36 = vld [vmem:[%s2128_s0 + $0x10] sm:$0xff]  ;;  %v1774_v37 = vld [vmem:[%s2128_s0 + $0x18] sm:$0xff]  ;;  %v1779_v38 = vld [vmem:[%s2128_s0 + $0x20] sm:$0xff] }
   0xc   :  { %1316 = vmatmul.mubr.msk.f32.vlgmr.msra.gmra.mrb[0].mxu0 %vm66_vm0, %v43_v12  ;;  %v1790_v39 = vld [vmem:[%s2128_s0 + $0x28] sm:$0xff]  ;;  %v1795_v40 = vld [vmem:[%s2128_s0 + $0x30] sm:$0xff]  ;;  %v1806_v41 = vld [vmem:[%s2128_s0 + $0x38] sm:$0xff] }
   0xd   :  { %1446 = vmatpush3.bf16.msra.mxu0 %v1443_v9  ;;  %1318 = vmatprep.mubr.msk.f32.mxu0 %vm66_vm0, %v44_v13  ;;  %v1811_v42 = vld [vmem:[%s2128_s0 + $0x40] sm:$0xff]  ;;  %v1821_v43 = vld [vmem:[%s2128_s0 + $0x48] sm:$0xff]  ;;  %v1826_v44 = vld [vmem:[%s2128_s0 + $0x50] sm:$0xff] }
   0xe   :  { %1448 = vmatprep.subr.bf16.mxu0 %v1447_v14  ;;  %1458 = vmatpush3.bf16.msra.mxu1 %v1455_v22  ;;  %v1835_v45 = vld [vmem:[%s2128_s0 + $0x58] sm:$0xff]  ;;  %v1840_v46 = vld [vmem:[%s2128_s0 + $0x60] sm:$0xff]  ;;  %v1849_v47 = vld [vmem:[%s2128_s0 + $0x68] sm:$0xff] }
   0xf   :  { %v1854_v48 = vld [vmem:[%s2128_s0 + $0x70] sm:$0xff]  ;;  %v1863_v49 = vld [vmem:[%s2128_s0 + $0x78] sm:$0xff]  ;;  %v588_v50 = vld [vmem:[%s2129_s5] sm:$0xff] }
  0x10   :  { %1319 = vmatmul.mubr.msk.f32.gmra.mrb[2].mxu0 %vm66_vm0, %v45_v15  ;;  %v589_v51 = vld [vmem:[%s2129_s5 + $0x8] sm:$0xff]  ;;  %v590_v53 = vld [vmem:[%s2129_s5 + $0x10] sm:$0xff]  ;;  %v591_v54 = vld [vmem:[%s2129_s5 + $0x18] sm:$0xff]  ;;  %s1598_s5 = smov 96  }
  0x11   :  { %1321 = vmatprep.mubr.msk.f32.mxu0 %vm66_vm0, %v46_v16  ;;  %1450 = vmatpush3.bf16.msra.mxu0 %v1447_v14  ;;  %v1459_v52 = vpack.c.bf16 %v589_v51, %v588_v50  ;;  %v1463_v55 = vpack.c.bf16 %v591_v54, %v590_v53  ;;  %v1882_v56 = vld [vmem:[%s2130_s4] ss:$0 sm:$0xff]  ;;  %s1597_s4 = smov 32  }
  0x12   :  { %1380 = vmatmul.mubr.msk.f32.vlgmr.msra.gmra.mrb[0].mxu1 %vm66_vm0, %v43_v12 }
  0x13   :  { %1382 = vmatprep.mubr.msk.f32.mxu1 %vm66_vm0, %v44_v13  ;;  %1460 = vmatprep.subr.bf16.mxu1 %v1459_v52 }
  0x14   :  { %1322 = vmatmul.mubr.msk.f32.gmra.mrb[4].mxu0 %vm66_vm0, %v47_v23  ;;  %1462 = vmatpush3.bf16.msra.mxu1 %v1459_v52 }
  0x15   :  { %1324 = vmatprep.mubr.msk.f32.mxu0 %vm66_vm0, %v48_v24  ;;  %1464 = vmatprep.subr.bf16.mxu1 %v1463_v55 }
  0x16   :  { %1383 = vmatmul.mubr.msk.f32.gmra.mrb[2].mxu1 %vm66_vm0, %v45_v15 }
  0x17   :  { %1385 = vmatprep.mubr.msk.f32.mxu1 %vm66_vm0, %v46_v16 }
  0x18   :  { %1325 = vmatmul.mubr.msk.f32.gmra.mrb[6].mxu0 %vm66_vm0, %v49_v25  ;;  %1466 = vmatpush3.bf16.msra.mxu1 %v1463_v55 }
  0x19   :  { %1327 = vmatprep.mubr.msk.f32.mxu0 %vm66_vm0, %v50_v26 }
  0x1a   :  { %1386 = vmatmul.mubr.msk.f32.gmra.mrb[4].mxu1 %vm66_vm0, %v47_v23 }
  0x1b   :  { %1388 = vmatprep.mubr.msk.f32.mxu1 %vm66_vm0, %v48_v24 }
  0x1c   :  { %1328 = vmatmul.mubr.msk.f32.gmra.mrb[8].mxu0 %vm66_vm0, %v51_v27 }
  0x1d   :  { %1330 = vmatprep.mubr.msk.f32.mxu0 %vm66_vm0, %v52_v28 }
  0x1e   :  { %1389 = vmatmul.mubr.msk.f32.gmra.mrb[6].mxu1 %vm66_vm0, %v49_v25 }
  0x1f   :  { %1391 = vmatprep.mubr.msk.f32.mxu1 %vm66_vm0, %v50_v26 }
  0x20   :  { %1331 = vmatmul.mubr.msk.f32.gmra.mrb[10].mxu0 %vm66_vm0, %v53_v29 }
  0x21   :  { %1333 = vmatprep.mubr.msk.f32.mxu0 %vm66_vm0, %v54_v30 }
  0x22   :  { %1392 = vmatmul.mubr.msk.f32.gmra.mrb[8].mxu1 %vm66_vm0, %v51_v27 }
  0x23   :  { %1394 = vmatprep.mubr.msk.f32.mxu1 %vm66_vm0, %v52_v28 }
  0x24   :  { %1334 = vmatmul.mubr.msk.f32.gmra.mrb[12].mxu0 %vm66_vm0, %v55_v31 }
  0x25   :  { %1336 = vmatprep.mubr.msk.f32.mxu0 %vm66_vm0, %v56_v32 }
  0x26   :  { %1395 = vmatmul.mubr.msk.f32.gmra.mrb[10].mxu1 %vm66_vm0, %v53_v29 }
  0x27   :  { %1397 = vmatprep.mubr.msk.f32.mxu1 %vm66_vm0, %v54_v30 }
  0x28   :  { %1337 = vmatmul.mubr.msk.f32.gmra.mrb[14].mxu0 %vm66_vm0, %v57_v33 }
  0x29   :  { %1347 = vmatprep.mubr.msk.f32.mxu0 %vm66_vm0, %v1748_v34 }
  0x2a   :  { %1398 = vmatmul.mubr.msk.f32.gmra.mrb[12].mxu1 %vm66_vm0, %v55_v31 }
  0x2b   :  { %1400 = vmatprep.mubr.msk.f32.mxu1 %vm66_vm0, %v56_v32 }
  0x2c   :  { %1348 = vmatmul.mubr.msk.f32.vlgmr.msra.gmra.mrb[0].mxu0 %vm66_vm0, %v1758_v35 }
  0x2d   :  { %1350 = vmatprep.mubr.msk.f32.mxu0 %vm66_vm0, %v1763_v36 }
  0x2e   :  { %1401 = vmatmul.mubr.msk.f32.gmra.mrb[14].mxu1 %vm66_vm0, %v57_v33 }
  0x30   :  { %1351 = vmatmul.mubr.msk.f32.gmra.mrb[2].mxu0 %vm66_vm0, %v1774_v37 }
  0x31   :  { %1353 = vmatprep.mubr.msk.f32.mxu0 %vm66_vm0, %v1779_v38 }
  0x34   :  { %1354 = vmatmul.mubr.msk.f32.gmra.mrb[4].mxu0 %vm66_vm0, %v1790_v39 }
  0x35   :  { %1356 = vmatprep.mubr.msk.f32.mxu0 %vm66_vm0, %v1795_v40 }
  0x38   :  { %1357 = vmatmul.mubr.msk.f32.gmra.mrb[6].mxu0 %vm66_vm0, %v1806_v41 }
  0x39   :  { %1359 = vmatprep.mubr.msk.f32.mxu0 %vm66_vm0, %v1811_v42 }
  0x3c   :  { %1360 = vmatmul.mubr.msk.f32.gmra.mrb[8].mxu0 %vm66_vm0, %v1821_v43 }
  0x3d   :  { %1362 = vmatprep.mubr.msk.f32.mxu0 %vm66_vm0, %v1826_v44 }
  0x40   :  { %1363 = vmatmul.mubr.msk.f32.gmra.mrb[10].mxu0 %vm66_vm0, %v1835_v45 }
  0x41   :  { %1365 = vmatprep.mubr.msk.f32.mxu0 %vm66_vm0, %v1840_v46 }
  0x44   :  { %1366 = vmatmul.mubr.msk.f32.gmra.mrb[12].mxu0 %vm66_vm0, %v1849_v47 }
  0x45   :  { %1368 = vmatprep.mubr.msk.f32.mxu0 %vm66_vm0, %v1854_v48 }
  0x48   :  { %1369 = vmatmul.mubr.msk.f32.gmra.mrb[14].mxu0 %vm66_vm0, %v1863_v49 }
  0xff   :  { %v1349_v57 = vpop.f32.mrb[0].mxu0 }
 0x100   :  { %v461_v58 = vadd.f32 %v1349_v57, %v1882_v56  ;;  %v374_v59 = vpop.f32.mrb[1].mxu0 }
 0x101   :  { %v460_v60 = vadd.f32 %v1882_v56, %v374_v59 }
 0x102   :  { %v1180_v61 = vmul.f32 -1.442695, %v461_v58 }
 0x103   :  { %v1179_v62 = vmul.f32 -1.442695, %v460_v60  ;;  %v1352_v63 = vpop.f32.mrb[2].mxu0 }
 0x104   :  { %1501 = vpow2.f32 %v1180_v61  ;;  %v463_v0 = vadd.f32 %v1352_v63, %v1882_v56  ;;  %v384_v1 = vpop.f32.mrb[3].mxu0 }
 0x105   :  { %1503 = vpow2.f32 %v1179_v62  ;;  %v462_v2 = vadd.f32 %v1882_v56, %v384_v1 }
 0x106   :  { %v1182_v3 = vmul.f32 -1.442695, %v463_v0 }
 0x107   :  { %v1181_v4 = vmul.f32 -1.442695, %v462_v2  ;;  %v1355_v5 = vpop.f32.mrb[4].mxu0 }
 0x108   :  { %1505 = vpow2.f32 %v1182_v3  ;;  %v465_v6 = vadd.f32 %v1355_v5, %v1882_v56  ;;  %v394_v7 = vpop.f32.mrb[5].mxu0 }
 0x109   :  { %1507 = vpow2.f32 %v1181_v4  ;;  %v464_v8 = vadd.f32 %v1882_v56, %v394_v7 }
 0x10a   :  { %v1184_v9 = vmul.f32 -1.442695, %v465_v6 }
 0x10b   :  { %v1183_v10 = vmul.f32 -1.442695, %v464_v8  ;;  %v1358_v11 = vpop.f32.mrb[6].mxu0 }
 0x10c   :  { %1509 = vpow2.f32 %v1184_v9  ;;  %v467_v12 = vadd.f32 %v1358_v11, %v1882_v56  ;;  %v404_v13 = vpop.f32.mrb[7].mxu0 }
 0x10d   :  { %1511 = vpow2.f32 %v1183_v10  ;;  %v466_v14 = vadd.f32 %v1882_v56, %v404_v13 }
 0x10e   :  { %v1502_v15 = vpop.eup %1501  ;;  %v1186_v16 = vmul.f32 -1.442695, %v467_v12 }
 0x10f   :  { %v1504_v17 = vpop.eup %1503  ;;  %v525_v18 = vadd.f32 1.0, %v1502_v15  ;;  %v1185_v19 = vmul.f32 -1.442695, %v466_v14  ;;  %v1361_v20 = vpop.f32.mrb[8].mxu0 }
 0x110   :  { %v524_v21 = vadd.f32 1.0, %v1504_v17  ;;  %1513 = vpow2.f32 %v1186_v16  ;;  %v469_v22 = vadd.f32 %v1361_v20, %v1882_v56  ;;  %v414_v23 = vpop.f32.mrb[9].mxu0 }
 0x111   :  { %1515 = vrcp.f32 %v525_v18  ;;  %v468_v24 = vadd.f32 %v1882_v56, %v414_v23 }
 0x112   :  { %v1506_v25 = vpop.eup %1505  ;;  %1517 = vrcp.f32 %v524_v21  ;;  %v1188_v26 = vmul.f32 -1.442695, %v469_v22 }
 0x113   :  { %v1508_v27 = vpop.eup %1507  ;;  %v527_v28 = vadd.f32 1.0, %v1506_v25  ;;  %1519 = vpow2.f32 %v1185_v19  ;;  %v1187_v29 = vmul.f32 -1.442695, %v468_v24  ;;  %v1364_v30 = vpop.f32.mrb[10].mxu0 }
 0x114   :  { %v526_v31 = vadd.f32 1.0, %v1508_v27  ;;  %1521 = vpow2.f32 %v1188_v26  ;;  %v471_v32 = vadd.f32 %v1364_v30, %v1882_v56  ;;  %v424_v33 = vpop.f32.mrb[11].mxu0 }
 0x115   :  { %1523 = vrcp.f32 %v527_v28  ;;  %v470_v50 = vadd.f32 %v1882_v56, %v424_v33 }
 0x116   :  { %v1510_v51 = vpop.eup %1509  ;;  %1525 = vrcp.f32 %v526_v31  ;;  %v1190_v52 = vmul.f32 -1.442695, %v471_v32 }
 0x117   :  { %v1512_v53 = vpop.eup %1511  ;;  %v529_v54 = vadd.f32 1.0, %v1510_v51  ;;  %1527 = vpow2.f32 %v1187_v29  ;;  %v1189_v55 = vmul.f32 -1.442695, %v470_v50  ;;  %v1367_v57 = vpop.f32.mrb[12].mxu0 }
 0x118   :  { %v528_v58 = vadd.f32 1.0, %v1512_v53  ;;  %1529 = vpow2.f32 %v1190_v52  ;;  %v473_v59 = vadd.f32 %v1367_v57, %v1882_v56  ;;  %v434_v60 = vpop.f32.mrb[13].mxu0 }
 0x119   :  { %1531 = vrcp.f32 %v529_v54  ;;  %v472_v61 = vadd.f32 %v1882_v56, %v434_v60 }
 0x11a   :  { %v1514_v62 = vpop.eup %1513  ;;  %1533 = vrcp.f32 %v528_v58  ;;  %v1192_v63 = vmul.f32 -1.442695, %v473_v59 }
 0x11b   :  { %v1898_v0 = vpop.eup %1515  ;;  %v531_v1 = vadd.f32 1.0, %v1514_v62  ;;  %1535 = vpow2.f32 %v1189_v55  ;;  %v1191_v2 = vmul.f32 -1.442695, %v472_v61  ;;  %v1370_v3 = vpop.f32.mrb[14].mxu0 }
 0x11c   :  { %v1900_v4 = vpop.eup %1517  ;;  %1537 = vpow2.f32 %v1192_v63  ;;  %v475_v5 = vadd.f32 %v1370_v3, %v1882_v56  ;;  %v444_v6 = vpop.f32.mrb[15].mxu0  ;;  %v573_v11 = vmul.f32 %v1898_v0, %v1758_v35 }
 0x11d   :  { %v1520_v7 = vpop.eup %1519  ;;  %v474_v8 = vadd.f32 %v1882_v56, %v444_v6  ;;  %v572_v9 = vmul.f32 %v1900_v4, %v1748_v34  ;;  %1539 = vpow2.f32 %v1191_v2 }
 0x11e   :  { %v1522_v10 = vpop.eup %1521  ;;  %v530_v12 = vadd.f32 1.0, %v1520_v7  ;;  %v1194_v13 = vmul.f32 -1.442695, %v475_v5  ;;  %1541 = vrcp.f32 %v531_v1 }
 0x11f   :  { %v1908_v14 = vpop.eup %1523  ;;  %v533_v15 = vadd.f32 1.0, %v1522_v10  ;;  %v1193_v16 = vmul.f32 -1.442695, %v474_v8  ;;  %1411 = vmatprep.mubr.msk.f32.mxu1 %vm66_vm0, %v572_v9 }
 0x120   :  { %v1911_v17 = vpop.eup %1525  ;;  %1543 = vrcp.f32 %v530_v12  ;;  %1412 = vmatmul.mubr.msk.f32.vlgmr.msra.gmra.mrb[0].mxu1 %vm66_vm0, %v573_v11  ;;  %v575_v21 = vmul.f32 %v1908_v14, %v1774_v37 }
 0x121   :  { %v1528_v56 = vpop.eup %1527  ;;  %1545 = vrcp.f32 %v533_v15  ;;  %v574_v18 = vmul.f32 %v1911_v17, %v1763_v36 }
 0x122   :  { %v1530_v19 = vpop.eup %1529  ;;  %v532_v20 = vadd.f32 1.0, %v1528_v56  ;;  %1547 = vpow2.f32 %v1194_v13 }
 0x123   :  { %v1918_v22 = vpop.eup %1531  ;;  %v535_v23 = vadd.f32 1.0, %v1530_v19  ;;  %1549 = vpow2.f32 %v1193_v16  ;;  %1414 = vmatprep.mubr.msk.f32.mxu1 %vm66_vm0, %v574_v18 }
 0x124   :  { %v1921_v24 = vpop.eup %1533  ;;  %1551 = vrcp.f32 %v532_v20  ;;  %1415 = vmatmul.mubr.msk.f32.gmra.mrb[2].mxu1 %vm66_vm0, %v575_v21  ;;  %v577_v29 = vmul.f32 %v1918_v22, %v1790_v39 }
 0x125   :  { %v1536_v25 = vpop.eup %1535  ;;  %v576_v26 = vmul.f32 %v1921_v24, %v1779_v38  ;;  %1553 = vrcp.f32 %v535_v23 }
 0x126   :  { %v1538_v27 = vpop.eup %1537  ;;  %v534_v28 = vadd.f32 1.0, %v1536_v25 }
 0x127   :  { %v537_v30 = vadd.f32 1.0, %v1538_v27  ;;  %1417 = vmatprep.mubr.msk.f32.mxu1 %vm66_vm0, %v576_v26  ;;  %v1540_v31 = vpop.eup %1539 }
 0x128   :  { %1555 = vrcp.f32 %v534_v28  ;;  %1418 = vmatmul.mubr.msk.f32.gmra.mrb[4].mxu1 %vm66_vm0, %v577_v29  ;;  %v1930_v32 = vpop.eup %1541  ;;  %v536_v33 = vadd.f32 1.0, %v1540_v31 }
 0x129   :  { %1557 = vrcp.f32 %v537_v30  ;;  %v579_v54 = vmul.f32 %v1930_v32, %v1806_v41 }
 0x12a   :  { %v1932_v50 = vpop.eup %1543  ;;  %1559 = vrcp.f32 %v536_v33 }
 0x12b   :  { %v1934_v51 = vpop.eup %1545  ;;  %v578_v52 = vmul.f32 %v1932_v50, %v1795_v40 }
 0x12c   :  { %v1548_v53 = vpop.eup %1547  ;;  %v581_v61 = vmul.f32 %v1934_v51, %v1821_v43 }
 0x12d   :  { %v1550_v55 = vpop.eup %1549  ;;  %v539_v57 = vadd.f32 1.0, %v1548_v53  ;;  %1420 = vmatprep.mubr.msk.f32.mxu1 %vm66_vm0, %v578_v52 }
 0x12e   :  { %v1941_v58 = vpop.eup %1551  ;;  %v538_v59 = vadd.f32 1.0, %v1550_v55  ;;  %1421 = vmatmul.mubr.msk.f32.gmra.mrb[6].mxu1 %vm66_vm0, %v579_v54 }
 0x12f   :  { %1561 = vrcp.f32 %v539_v57  ;;  %v580_v60 = vmul.f32 %v1941_v58, %v1811_v42  ;;  %v1948_v62 = vpop.eup %1553 }
 0x130   :  { %1563 = vrcp.f32 %v538_v59  ;;  %v583_v3 = vmul.f32 %v1948_v62, %v1835_v45 }
 0x131   :  { %1423 = vmatprep.mubr.msk.f32.mxu1 %vm66_vm0, %v580_v60 }
 0x132   :  { %v1951_v63 = vpop.eup %1555  ;;  %1424 = vmatmul.mubr.msk.f32.gmra.mrb[8].mxu1 %vm66_vm0, %v581_v61 }
 0x133   :  { %v582_v1 = vmul.f32 %v1951_v63, %v1826_v44  ;;  %v1956_v2 = vpop.eup %1557 }
 0x134   :  { %v1960_v5 = vpop.eup %1559  ;;  %v585_v7 = vmul.f32 %v1956_v2, %v1849_v47 }
 0x135   :  { %1426 = vmatprep.mubr.msk.f32.mxu1 %vm66_vm0, %v582_v1  ;;  %v584_v6 = vmul.f32 %v1960_v5, %v1840_v46 }
 0x136   :  { %1427 = vmatmul.mubr.msk.f32.gmra.mrb[10].mxu1 %vm66_vm0, %v583_v3 }
 0x137   :  { %1429 = vmatprep.mubr.msk.f32.mxu1 %vm66_vm0, %v584_v6 }
 0x139   :  { %v1969_v8 = vpop.eup %1561 }
 0x13a   :  { %v1971_v9 = vpop.eup %1563  ;;  %1430 = vmatmul.mubr.msk.f32.gmra.mrb[12].mxu1 %vm66_vm0, %v585_v7  ;;  %v587_v11 = vmul.f32 %v1969_v8, %v1863_v49 }
 0x13b   :  { %v586_v10 = vmul.f32 %v1971_v9, %v1854_v48 }
 0x13d   :  { %1432 = vmatprep.mubr.msk.f32.mxu1 %vm66_vm0, %v586_v10 }
 0x13e   :  { %1433 = vmatmul.mubr.msk.f32.gmra.mrb[14].mxu1 %vm66_vm0, %v587_v11 }
 0x1f3   :  { %v1413_v12 = vpop.f32.mrb[0].mxu1 }
 0x1f4   :  { %1565 = vtanh.f32 %v1413_v12  ;;  %v855_v13 = vpop.f32.mrb[1].mxu1 }
 0x1f5   :  { %1567 = vtanh.f32 %v855_v13 }
 0x1f7   :  { %v1416_v15 = vpop.f32.mrb[2].mxu1 }
 0x1f8   :  { %1569 = vtanh.f32 %v1416_v15  ;;  %v865_v16 = vpop.f32.mrb[3].mxu1 }
 0x1f9   :  { %1571 = vtanh.f32 %v865_v16 }
 0x1fb   :  { %v1419_v56 = vpop.f32.mrb[4].mxu1 }
 0x1fc   :  { %v875_v18 = vpop.f32.mrb[5].mxu1 }
 0x1fd   :  { %1573 = vtanh.f32 %v875_v18 }
 0x1fe   :  { %v1566_v19 = vpop.eup %1565  ;;  %1575 = vtanh.f32 %v1419_v56 }
 0x1ff   :  { %v951_v20 = vsub.f32 %v1566_v19, %v1758_v35  ;;  %v1568_v21 = vpop.eup %1567 }
 0x200   :  { %v950_v27 = vsub.f32 %v1568_v21, %v1748_v34 }
 0x201   :  { %v1422_v23 = vpop.f32.mrb[6].mxu1  ;;  %984 = vrot.lane.b32.xlu0 %v951_v20, %s1597_s4 }
 0x202   :  { %v1570_v25 = vpop.eup %1569  ;;  %1577 = vtanh.f32 %v1422_v23  ;;  %v885_v26 = vpop.f32.mrb[7].mxu1 }
 0x203   :  { %1579 = vtanh.f32 %v885_v26  ;;  %v953_v28 = vsub.f32 %v1570_v25, %v1774_v37  ;;  %v1572_v29 = vpop.eup %1571 }
 0x204   :  { %v952_v52 = vsub.f32 %v1572_v29, %v1763_v36 }
 0x205   :  { %v1425_v30 = vpop.f32.mrb[8].mxu1  ;;  %982 = vrot.lane.b32.xlu0 %v950_v27, %s1597_s4  ;;  %988 = vrot.lane.b32.xlu1 %v953_v28, %s1597_s4 }
 0x206   :  { %1581 = vtanh.f32 %v1425_v30  ;;  %v895_v31 = vpop.f32.mrb[9].mxu1 }
 0x207   :  { %v1574_v33 = vpop.eup %1573  ;;  %1583 = vtanh.f32 %v895_v31 }
 0x208   :  { %v1576_v53 = vpop.eup %1575  ;;  %v954_v54 = vsub.f32 %v1574_v33, %v1779_v38 }
 0x209   :  { %v1428_v55 = vpop.f32.mrb[10].mxu1  ;;  %986 = vrot.lane.b32.xlu1 %v952_v52, %s1597_s4  ;;  %v955_v59 = vsub.f32 %v1576_v53, %v1790_v39 }
 0x20a   :  { %1585 = vtanh.f32 %v1428_v55  ;;  %v905_v57 = vpop.f32.mrb[11].mxu1  ;;  %990 = vrot.lane.b32.xlu0 %v954_v54, %s1597_s4 }
 0x20b   :  { %1587 = vtanh.f32 %v905_v57 }
 0x20c   :  { %v1578_v60 = vpop.eup %1577 }
 0x20d   :  { %v1580_v61 = vpop.eup %1579  ;;  %v1431_v1 = vpop.f32.mrb[12].mxu1  ;;  %992 = vrot.lane.b32.xlu1 %v955_v59, %s1597_s4  ;;  %v957_v7 = vsub.f32 %v1578_v60, %v1806_v41 }
 0x20e   :  { %1589 = vtanh.f32 %v1431_v1  ;;  %v915_v3 = vpop.f32.mrb[13].mxu1  ;;  %v956_v6 = vsub.f32 %v1580_v61, %v1795_v40 }
 0x20f   :  { %1591 = vtanh.f32 %v915_v3 }
 0x210   :  { %v1582_v10 = vpop.eup %1581  ;;  %994 = vrot.lane.b32.xlu0 %v956_v6, %s1597_s4 }
 0x211   :  { %v1584_v11 = vpop.eup %1583  ;;  %v1434_v12 = vpop.f32.mrb[14].mxu1  ;;  %996 = vrot.lane.b32.xlu1 %v957_v7, %s1597_s4  ;;  %v959_v16 = vsub.f32 %v1582_v10, %v1821_v43 }
 0x212   :  { %1593 = vtanh.f32 %v1434_v12  ;;  %v925_v13 = vpop.f32.mrb[15].mxu1  ;;  %v958_v15 = vsub.f32 %v1584_v11, %v1811_v42 }
 0x213   :  { %1595 = vtanh.f32 %v925_v13 }
 0x214   :  { %v1586_v56 = vpop.eup %1585  ;;  %998 = vrot.lane.b32.xlu0 %v958_v15, %s1597_s4 }
 0x215   :  { %v1588_v18 = vpop.eup %1587  ;;  %1000 = vrot.lane.b32.xlu1 %v959_v16, %s1597_s4  ;;  %v961_v20 = vsub.f32 %v1586_v56, %v1835_v45 }
 0x216   :  { %v960_v19 = vsub.f32 %v1588_v18, %v1826_v44 }
 0x218   :  { %v1590_v21 = vpop.eup %1589  ;;  %1002 = vrot.lane.b32.xlu0 %v960_v19, %s1597_s4 }
 0x219   :  { %v1592_v23 = vpop.eup %1591  ;;  %1004 = vrot.lane.b32.xlu1 %v961_v20, %s1597_s4  ;;  %v963_v26 = vsub.f32 %v1590_v21, %v1849_v47 }
 0x21a   :  { %v962_v25 = vsub.f32 %v1592_v23, %v1840_v46 }
 0x21c   :  { %v1594_v27 = vpop.eup %1593  ;;  %1006 = vrot.lane.b32.xlu0 %v962_v25, %s1597_s4 }
 0x21d   :  { %v1596_v28 = vpop.eup %1595  ;;  %1008 = vrot.lane.b32.xlu1 %v963_v26, %s1597_s4  ;;  %v965_v30 = vsub.f32 %v1594_v27, %v1863_v49 }
 0x21e   :  { %v964_v29 = vsub.f32 %v1596_v28, %v1854_v48 }
 0x220   :  { %1010 = vrot.lane.b32.xlu0 %v964_v29, %s1597_s4 }
 0x221   :  { %1012 = vrot.lane.b32.xlu1 %v965_v30, %s1597_s4 }
 0x273   :  { %v985_v31 = vpop.permute.xlu0 %984 }
 0x274   :  { %v1031_v33 = vmul.f32 %v1898_v0, %v985_v31 }
 0x276   :  { %1064 = vrot.lane.b32.xlu1 %v1031_v33, %s1598_s5 }
 0x277   :  { %v983_v52 = vpop.permute.xlu0 %982  ;;  %v989_v53 = vpop.permute.xlu1 %988 }
 0x278   :  { %v1030_v54 = vmul.f32 %v1900_v4, %v983_v52  ;;  %v1033_v55 = vmul.f32 %v1908_v14, %v989_v53 }
 0x27a   :  { %1068 = vrot.lane.b32.xlu1 %v1033_v55, %s1598_s5  ;;  %1062 = vrot.lane.b32.xlu0 %v1030_v54, %s1598_s5 }
 0x27b   :  { %v987_v57 = vpop.permute.xlu1 %986 }
 0x27c   :  { %v1032_v59 = vmul.f32 %v1911_v17, %v987_v57  ;;  %v991_v60 = vpop.permute.xlu0 %990 }
 0x27d   :  { %v1034_v61 = vmul.f32 %v1921_v24, %v991_v60 }
 0x27e   :  { %1066 = vrot.lane.b32.xlu0 %v1032_v59, %s1598_s5 }
 0x27f   :  { %v993_v0 = vpop.permute.xlu1 %992 }
 0x280   :  { %v1035_v1 = vmul.f32 %v1918_v22, %v993_v0 }
 0x282   :  { %v995_v3 = vpop.permute.xlu0 %994  ;;  %1072 = vrot.lane.b32.xlu1 %v1035_v1, %s1598_s5  ;;  %1070 = vrot.lane.b32.xlu0 %v1034_v61, %s1598_s5 }
 0x283   :  { %v997_v4 = vpop.permute.xlu1 %996  ;;  %v1036_v14 = vmul.f32 %v1932_v50, %v995_v3 }
 0x284   :  { %v1037_v6 = vmul.f32 %v1930_v32, %v997_v4 }
 0x286   :  { %v999_v7 = vpop.permute.xlu0 %998  ;;  %1076 = vrot.lane.b32.xlu1 %v1037_v6, %s1598_s5  ;;  %1074 = vrot.lane.b32.xlu0 %v1036_v14, %s1598_s5 }
 0x287   :  { %v1001_v17 = vpop.permute.xlu1 %1000  ;;  %v1038_v24 = vmul.f32 %v1941_v58, %v999_v7 }
 0x288   :  { %v1039_v22 = vmul.f32 %v1934_v51, %v1001_v17 }
 0x28a   :  { %v1003_v10 = vpop.permute.xlu0 %1002  ;;  %1080 = vrot.lane.b32.xlu1 %v1039_v22, %s1598_s5  ;;  %1078 = vrot.lane.b32.xlu0 %v1038_v24, %s1598_s5 }
 0x28b   :  { %v1005_v11 = vpop.permute.xlu1 %1004  ;;  %v1040_v50 = vmul.f32 %v1951_v63, %v1003_v10 }
 0x28c   :  { %v1041_v32 = vmul.f32 %v1948_v62, %v1005_v11 }
 0x28e   :  { %v1007_v12 = vpop.permute.xlu0 %1006  ;;  %1084 = vrot.lane.b32.xlu1 %v1041_v32, %s1598_s5  ;;  %1082 = vrot.lane.b32.xlu0 %v1040_v50, %s1598_s5 }
 0x28f   :  { %v1009_v13 = vpop.permute.xlu1 %1008  ;;  %v1042_v58 = vmul.f32 %v1960_v5, %v1007_v12 }
 0x290   :  { %v1043_v51 = vmul.f32 %v1956_v2, %v1009_v13 }
 0x292   :  { %v1011_v15 = vpop.permute.xlu0 %1010  ;;  %1088 = vrot.lane.b32.xlu1 %v1043_v51, %s1598_s5  ;;  %1086 = vrot.lane.b32.xlu0 %v1042_v58, %s1598_s5 }
 0x293   :  { %v1013_v16 = vpop.permute.xlu1 %1012  ;;  %v1044_v63 = vmul.f32 %v1971_v9, %v1011_v15 }
 0x294   :  { %v1045_v62 = vmul.f32 %v1969_v8, %v1013_v16 }
 0x296   :  { %1092 = vrot.lane.b32.xlu1 %v1045_v62, %s1598_s5  ;;  %1090 = vrot.lane.b32.xlu0 %v1044_v63, %s1598_s5 }
 0x2e8   :  { %v1065_v56 = vpop.permute.xlu1 %1064 }
 0x2e9   :  { %v1111_v18 = vadd.f32 %v1065_v56, %v1758_v35 }
 0x2eb   :  { %1127 = vst.msk [vmem:[%s2131_s7 + $0x8] sm:$0xff] %vm66_vm0, %v1111_v18 }
 0x2ec   :  { %v1069_v2 = vpop.permute.xlu1 %1068  ;;  %v1063_v5 = vpop.permute.xlu0 %1062 }
 0x2ed   :  { %v1113_v19 = vadd.f32 %v1069_v2, %v1774_v37  ;;  %v1110_v9 = vadd.f32 %v1063_v5, %v1748_v34 }
 0x2ef   :  { %1129 = vst.msk [vmem:[%s2131_s7 + $0x18] sm:$0xff] %vm66_vm0, %v1113_v19  ;;  %1126 = vst.msk [vmem:[%s2131_s7] sm:$0xff] %vm66_vm0, %v1110_v9 }
 0x2f0   :  { %v1067_v35 = vpop.permute.xlu0 %1066 }
 0x2f1   :  { %v1112_v8 = vadd.f32 %v1067_v35, %v1763_v36 }
 0x2f3   :  { %1128 = vst.msk [vmem:[%s2131_s7 + $0x10] sm:$0xff] %vm66_vm0, %v1112_v8 }
 0x2f4   :  { %v1073_v37 = vpop.permute.xlu1 %1072  ;;  %v1071_v34 = vpop.permute.xlu0 %1070 }
 0x2f5   :  { %v1115_v20 = vadd.f32 %v1073_v37, %v1790_v39  ;;  %v1114_v21 = vadd.f32 %v1071_v34, %v1779_v38 }
 0x2f7   :  { %1131 = vst.msk [vmem:[%s2131_s7 + $0x28] sm:$0xff] %vm66_vm0, %v1115_v20  ;;  %1130 = vst.msk [vmem:[%s2131_s7 + $0x20] sm:$0xff] %vm66_vm0, %v1114_v21 }
 0x2f8   :  { %v1077_v36 = vpop.permute.xlu1 %1076  ;;  %v1075_v23 = vpop.permute.xlu0 %1074 }
 0x2f9   :  { %v1117_v25 = vadd.f32 %v1077_v36, %v1806_v41  ;;  %v1116_v26 = vadd.f32 %v1075_v23, %v1795_v40 }
 0x2fb   :  { %1133 = vst.msk [vmem:[%s2131_s7 + $0x38] sm:$0xff] %vm66_vm0, %v1117_v25  ;;  %1132 = vst.msk [vmem:[%s2131_s7 + $0x30] sm:$0xff] %vm66_vm0, %v1116_v26 }
 0x2fc   :  { %v1081_v38 = vpop.permute.xlu1 %1080  ;;  %v1079_v39 = vpop.permute.xlu0 %1078 }
 0x2fd   :  { %v1119_v27 = vadd.f32 %v1081_v38, %v1821_v43  ;;  %v1118_v28 = vadd.f32 %v1079_v39, %v1811_v42 }
 0x2ff   :  { %1135 = vst.msk [vmem:[%s2131_s7 + $0x48] sm:$0xff] %vm66_vm0, %v1119_v27  ;;  %1134 = vst.msk [vmem:[%s2131_s7 + $0x40] sm:$0xff] %vm66_vm0, %v1118_v28 }
 0x300   :  { %v1085_v40 = vpop.permute.xlu1 %1084  ;;  %v1083_v41 = vpop.permute.xlu0 %1082 }
 0x301   :  { %v1121_v29 = vadd.f32 %v1085_v40, %v1835_v45  ;;  %v1120_v30 = vadd.f32 %v1083_v41, %v1826_v44 }
 0x303   :  { %1137 = vst.msk [vmem:[%s2131_s7 + $0x58] sm:$0xff] %vm66_vm0, %v1121_v29  ;;  %1136 = vst.msk [vmem:[%s2131_s7 + $0x50] sm:$0xff] %vm66_vm0, %v1120_v30 }
 0x304   :  { %v1089_v42 = vpop.permute.xlu1 %1088  ;;  %v1087_v43 = vpop.permute.xlu0 %1086 }
 0x305   :  { %v1123_v31 = vadd.f32 %v1089_v42, %v1849_v47  ;;  %v1122_v33 = vadd.f32 %v1087_v43, %v1840_v46 }
 0x307   :  { %1139 = vst.msk [vmem:[%s2131_s7 + $0x68] sm:$0xff] %vm66_vm0, %v1123_v31  ;;  %1138 = vst.msk [vmem:[%s2131_s7 + $0x60] sm:$0xff] %vm66_vm0, %v1122_v33 }
 0x308   :  { %v1093_v44 = vpop.permute.xlu1 %1092  ;;  %v1091_v45 = vpop.permute.xlu0 %1090 }
 0x309   :  { %v1125_v52 = vadd.f32 %v1093_v44, %v1863_v49  ;;  %v1124_v53 = vadd.f32 %v1091_v45, %v1854_v48 }
 0x30b   :  { %1141 = vst.msk [vmem:[%s2131_s7 + $0x78] sm:$0xff] %vm66_vm0, %v1125_v52  ;;  %1140 = vst.msk [vmem:[%s2131_s7 + $0x70] sm:$0xff] %vm66_vm0, %v1124_v53 }

</bundles_post_ra>
